<compile_context>
chip_gen: v7x
topology: tpu7x:2x2x1
jax: 0.10.0
libtpu: 0.0.40
codegen_flags: <defaults>
</compile_context>

<pallas_src>
import functools

import jax
import jax.numpy as jnp
from jax import lax
from jax.experimental import pallas as pl
from jax.experimental.pallas import tpu as pltpu


def _round_up(x, m):
    return ((x + m - 1) // m) * m


_VMEM_LIMIT_BYTES = 48 * 1024 * 1024   # < v7x 64 MiB physical, ample on v5e/v6e


# ---------------------------------------------------------------------------
# Kernels
# ---------------------------------------------------------------------------

def _matvec_kernel(vec_ref, enc_ref, o_ref):
    # vec: (1, H)   enc tile: (TS, H)   o tile: (1, TS)
    # scores[s] = sum_h enc[s, h] * vec[h] — contract last axes, no transpose.
    o_ref[...] = lax.dot_general(
        vec_ref[...], enc_ref[...],
        dimension_numbers=(((1,), (1,)), ((), ())),
        preferred_element_type=jnp.float32)


def _concat_kernel(dproj_ref, w_ref, v_ref, enc_ref, o_ref, *, mxu_dtype):
    # dproj: (1, H) f32 = dec @ W^T (hoisted)   W: (H, H)   v: (1, H) f32
    # enc tile: (TS, H)   o: (1, TS)
    # tanh((dec + enc) @ W^T) == tanh(enc @ W^T + dec @ W^T)
    t = lax.dot_general(                                    # MXU, f32 accumulate
        enc_ref[...].astype(mxu_dtype), w_ref[...].astype(mxu_dtype),
        dimension_numbers=(((1,), (1,)), ((), ())),
        preferred_element_type=jnp.float32)                 # (TS, H) f32
    t = jnp.tanh(t + dproj_ref[...])                        # bias + tanh in f32
    o_ref[...] = lax.dot_general(                           # v . t (per row)
        v_ref[...], t,
        dimension_numbers=(((1,), (1,)), ((), ())),
        preferred_element_type=jnp.float32)                 # (1, TS)


# ---------------------------------------------------------------------------
# Wrapper
# ---------------------------------------------------------------------------

def _choose_s_tile(S, H, itemsize, method, max_tile_s=None):
    """Method-aware S tile.

    dot/general are HBM-streaming: pick the largest lane-dense (multiple of
    128) tile whose double-buffered enc slab fits an ~8 MiB/buffer budget
    (budget uses the lane-padded width, which is what VMEM actually holds).
    concat is compute-bound, so a modest 512-row tile already amortizes the
    per-step overhead while keeping the f32 (TS, H) intermediates small.
    """
    if max_tile_s is None:
        if method == "concat":
            max_tile_s = 512
        else:
            budget = 8 * 1024 * 1024                       # per enc buffer
            lane_row = _round_up(H, 128) * itemsize        # VMEM bytes per row
            max_tile_s = max(128, ((budget // lane_row) // 128) * 128)
    if S <= max_tile_s:
        return S                 # single full-extent tile (full-dim block is legal)
    return max_tile_s            # lane-dense; ragged last tile handled by Pallas


def attention_forward(decoder_hidden, encoder_outputs, params=None, method="dot",
                      max_tile_s=None, concat_mxu_dtype=jnp.bfloat16):
    """Mirror of Attention.forward.

    decoder_hidden  : (1, H)
    encoder_outputs : (1, S, H)  — streamed straight from HBM (no pad/astype copy)
    params          : {'fc_weight': (H, H), 'weight': (1, H)} as needed
    concat_mxu_dtype: dtype fed to the MXU for the concat (TS,H)@(H,H) matmul.
                      bf16 (default) ≈3x MXU throughput with f32 accumulation;
                      pass jnp.float32 for bit-strict behaviour.
    returns         : (1, S) float32 attention scores
    """
    params = params or {}
    B, S, H = encoder_outputs.shape
    assert B == 1, "module hard-codes batch 1 via .view(1, -1, 1)"

    enc = encoder_outputs.reshape(S, H)            # metadata-only reshape, no copy
    dec = decoder_hidden.reshape(1, H)
    itemsize = jnp.dtype(enc.dtype).itemsize

    TS = _choose_s_tile(S, H, itemsize, method, max_tile_s)
    grid = (pl.cdiv(S, TS),)                       # ragged last tile: rows are
                                                   # independent; OOB scores are
                                                   # never written back.

    enc_spec = pl.BlockSpec((TS, H), lambda i: (i, 0))   # streamed, double-buffered
    vec_spec = pl.BlockSpec((1, H), lambda i: (0, 0))    # constant index -> DMA'd once
    mat_spec = pl.BlockSpec((H, H), lambda i: (0, 0))
    out_spec = pl.BlockSpec((1, TS), lambda i: (0, i))   # lane-dense stores
    out_shape = jax.ShapeDtypeStruct((1, S), jnp.float32)
    cparams = pltpu.CompilerParams(
        dimension_semantics=("parallel",),
        vmem_limit_bytes=_VMEM_LIMIT_BYTES)

    if method in ("dot", "general"):
        if method == "general":
            # Tiny (1,H)x(H,H) projection: plain XLA, not worth a kernel launch.
            vec = jnp.einsum("ij,kj->ik", dec.astype(jnp.float32),
                             params["fc_weight"].astype(jnp.float32))
        else:
            vec = dec
        cost = pl.CostEstimate(
            flops=2 * S * H,
            transcendentals=0,
            bytes_accessed=S * H * itemsize + H * itemsize + S * 4)
        scores = pl.pallas_call(
            _matvec_kernel,
            out_shape=out_shape,
            grid=grid,
            in_specs=[vec_spec, enc_spec],
            out_specs=out_spec,
            compiler_params=cparams,
            cost_estimate=cost,
        )(vec.astype(enc.dtype), enc)

    elif method == "concat":
        w = params["fc_weight"]
        v = params["weight"].astype(jnp.float32)
        # Hoist dec @ W^T out of the S loop; it becomes a bias inside the kernel.
        dproj = jnp.einsum("ij,kj->ik", dec.astype(jnp.float32),
                           w.astype(jnp.float32))
        cost = pl.CostEstimate(
            flops=2 * S * H * H + 4 * S * H,
            transcendentals=S * H,
            bytes_accessed=(S * H * itemsize
                            + H * H * jnp.dtype(w.dtype).itemsize
                            + 2 * H * 4 + S * 4))
        kernel = functools.partial(_concat_kernel, mxu_dtype=concat_mxu_dtype)
        scores = pl.pallas_call(
            kernel,
            out_shape=out_shape,
            grid=grid,
            in_specs=[vec_spec, mat_spec, vec_spec, enc_spec],
            out_specs=out_spec,
            compiler_params=cparams,
            cost_estimate=cost,
        )(dproj, w, v, enc)
    else:
        raise ValueError(f"unknown method {method!r}")

    return scores


# Pure-JAX reference (mirrors the PyTorch forward) for correctness checks.
def attention_reference(decoder_hidden, encoder_outputs, params, method="dot"):
    if method == "dot":
        return jnp.einsum("bsh,h->bs", encoder_outputs, decoder_hidden.reshape(-1))
    elif method == "general":
        out = decoder_hidden @ params["fc_weight"].T
        return jnp.einsum("bsh,h->bs", encoder_outputs, out.reshape(-1))
    elif method == "concat":
        out = jnp.tanh((decoder_hidden[:, None, :] + encoder_outputs)
                       @ params["fc_weight"].T)
        return jnp.einsum("bsh,h->bs", out, params["weight"].reshape(-1))


if __name__ == "__main__":
    def make_case(key, S, H):
        k1, k2, k3, k4 = jax.random.split(key, 4)
        dec = jax.random.normal(k1, (1, H), dtype=jnp.float32)
        enc = jax.random.normal(k2, (1, S, H), dtype=jnp.float32)
        params = {
            "fc_weight": jax.random.normal(k3, (H, H), dtype=jnp.float32) * 0.1,
            "weight": jax.random.normal(k4, (1, H), dtype=jnp.float32) * 0.1,
        }
        return dec, enc, params

    key = jax.random.PRNGKey(0)
    k_a, k_b = jax.random.split(key)
    ok = True

    # (1) module-sized case (seq=8, hidden=32), strict f32 check (f32 MXU for concat).
    dec, enc, params = make_case(k_a, S=8, H=32)
    for method in ("dot", "general", "concat"):
        out = jax.block_until_ready(
            attention_forward(dec, enc, params, method=method,
                              concat_mxu_dtype=jnp.float32))
        ref = attention_reference(dec, enc, params, method=method)
        assert out.shape == ref.shape == (1, 8), (method, out.shape)
        if not jnp.allclose(out, ref, atol=1e-3, rtol=1e-3):
            ok = False
            print(f"MISMATCH f32 method={method}")

    # (2) multi-tile path (ragged last S tile, H not a multiple of 128), strict f32.
    dec, enc, params = make_case(k_b, S=300, H=96)
    for method in ("dot", "general", "concat"):
        out = jax.block_until_ready(
            attention_forward(dec, enc, params, method=method, max_tile_s=128,
                              concat_mxu_dtype=jnp.float32))
        ref = attention_reference(dec, enc, params, method=method)
        assert out.shape == ref.shape == (1, 300), (method, out.shape)
        if not jnp.allclose(out, ref, atol=1e-3, rtol=1e-3):
            ok = False
            print(f"MISMATCH tiled-f32 method={method}")

    # (3) concat default path (bf16 MXU inputs, f32 accumulation) — looser check.
    for k, (S, H) in ((k_a, (8, 32)), (k_b, (300, 96))):
        dec, enc, params = make_case(k, S=S, H=H)
        out = jax.block_until_ready(
            attention_forward(dec, enc, params, method="concat"))
        ref = attention_reference(dec, enc, params, method="concat")
        if not jnp.allclose(out, ref, atol=5e-2, rtol=5e-2):
            ok = False
            print(f"MISMATCH bf16-mxu concat S={S} H={H}")

    if ok:
        print("KERNEL_OK")
</pallas_src>

<mosaic_0001>
module attributes {stable_mosaic.version = 11 : i64} {
  func.func @_matvec_kernel(%arg0: i32, %arg1: memref<1x32xf32, #tpu.memory_space<vmem>>, %arg2: memref<8x32xf32, #tpu.memory_space<vmem>>, %arg3: memref<1x8xf32, #tpu.memory_space<vmem>>) attributes {dimension_semantics = [#tpu.dimension_semantics<parallel>], iteration_bounds = array<i64: 1>, scalar_prefetch = 0 : i64, scratch_operands = 0 : i64, tpu.core_type = #tpu.core_type<tc>, window_params = [{pipeline_mode = #tpu.pipeline_mode<synchronous>, transform_indices = @transform_0, window_bounds = array<i64: 1, 32>}, {transform_indices = @transform_1, window_bounds = array<i64: 8, 32>}, {transform_indices = @transform_2, window_bounds = array<i64: 1, 8>}]} {
    %c0 = arith.constant 0 : index
    %c0_0 = arith.constant 0 : index
    %0 = vector.load %arg1[%c0, %c0_0] : memref<1x32xf32, #tpu.memory_space<vmem>>, vector<1x32xf32>
    %c0_1 = arith.constant 0 : index
    %c0_2 = arith.constant 0 : index
    %1 = vector.load %arg2[%c0_1, %c0_2] : memref<8x32xf32, #tpu.memory_space<vmem>>, vector<8x32xf32>
    %cst = arith.constant dense<0.000000e+00> : vector<1x8xf32>
    %2 = tpu.matmul %0, %1, %cst {dimension_numbers = #tpu.dot_dimension_numbers<[1], [1], [0], [0], [0, 0, 1, 0], [], []>} : vector<1x32xf32>, vector<8x32xf32>, vector<1x8xf32> -> vector<1x8xf32>
    %c0_3 = arith.constant 0 : index
    %c0_4 = arith.constant 0 : index
    %3 = vector.load %arg3[%c0_3, %c0_4] : memref<1x8xf32, #tpu.memory_space<vmem>>, vector<1x8xf32>
    tpu.vector_store %arg3[%c0_3, %c0_4], %2 {strides = array<i32>} : memref<1x8xf32, #tpu.memory_space<vmem>>, vector<1x8xf32>,
    return
  }
  func.func @transform_0(%arg0: i32) -> (i32, i32) {
    %c0_i32 = arith.constant 0 : i32
    %c0_i32_0 = arith.constant 0 : i32
    %c0_i32_1 = arith.constant 0 : i32
    return %c0_i32, %c0_i32_0 : i32, i32
  }
  func.func @transform_1(%arg0: i32) -> (i32, i32) {
    %c0_i32 = arith.constant 0 : i32
    %c0_i32_0 = arith.constant 0 : i32
    return %arg0, %c0_i32 : i32, i32
  }
  func.func @transform_2(%arg0: i32) -> (i32, i32) {
    %c0_i32 = arith.constant 0 : i32
    %c0_i32_0 = arith.constant 0 : i32
    return %c0_i32, %arg0 : i32, i32
  }
}

</mosaic_0001>

<bundles_post_ra>
// kernel: tpu_custom_call.1
= control target key start
LH: loop header
LB: loop body
LE: loop exit
PB: predicated region body
PF: predicated region fallthrough
CT: control target
= control target key end

     0   :  { %7 = vsyncpa [#allocation3], 0  ;;  %s275_s0 = inlined_call_operand.hbm [shape: f32[1,32], index: 0, kind: input, shape index: {}]   ;;  %s276_s1 = inlined_call_operand.hbm [shape: f32[8,32], index: 1, kind: input, shape index: {}]   ;;  %s277_s2 = inlined_call_operand.hbm [shape: f32[1,8], index: 2, kind: output, shape index: {}]  }
   0x1   :  { %8 = vsyncpa [#allocation6], 0 }
   0x2   :  { %9 = vsyncpa [#allocation4], 0  ;;  %s219_s9 = smov [#allocation2]   ;;  %s220_s11 = smov [#allocation5]  }
   0x3   :  { %s16_s10 = sshll.u32 %s219_s9, 4  ;;  %s26_s12 = sshll.u32 %s220_s11, 4  ;;  %s17_s10 = int_to_ptr.vmem [resolvable:$true] %s16_s10  ;;  %s27_s12 = int_to_ptr.vmem [resolvable:$true] %s26_s12 }
   0x4   :  { %s147_s15 = scalar_lea.hbm %s275_s0, 16 }
   0x5   :  { %p148_p0 = scmp.ne.s32.totalorder %s275_s0, %s147_s15  ;;  %p151_p1 = scmp.lt.u32.totalorder %s147_s15, %s275_s0 }
   0x7   :  { %p153_p2 = pnand %p151_p1, %p148_p0 }
   0x9   :  { %156 = shalt.err (!%p153_p2)
}
   0xa   :  { %s157_s20 = scalar_lea.vmem %s17_s10, 16  ;;  %s161_s21 = scalar_lea.vmem %s17_s10, 32 }
   0xb   :  { %p158_p3 = scmp.ne.s32.totalorder %s17_s10, %s157_s20  ;;  %p162_p4 = scmp.lt.s32.totalorder %s17_s10, %s17_s10 }
   0xc   :  { %p163_p5 = scmp.lt.s32.totalorder %s161_s21, %s157_s20 }
   0xe   :  { %p164_p6 = por %p163_p5, %p162_p4 }
  0x10   :  { %p165_p7 = pnand %p164_p6, %p158_p3 }
  0x12   :  { %168 = shalt.err (!%p165_p7)
}
  0x13   :  { %19 = dma.hbm_to_vmem [thread:$0]  %s275_s0, 16, %s17_s10, [#allocation3]  }
  0x14   :  { %s169_s26 = scalar_lea.hbm %s276_s1, 128 }
  0x15   :  { %p170_p8 = scmp.ne.s32.totalorder %s276_s1, %s169_s26  ;;  %p173_p9 = scmp.lt.u32.totalorder %s169_s26, %s276_s1 }
  0x17   :  { %p175_p10 = pnand %p173_p9, %p170_p8 }
  0x19   :  { %178 = shalt.err (!%p175_p10)
}
  0x1a   :  { %s179_s3 = scalar_lea.vmem %s27_s12, 128  ;;  %p184_p12 = scmp.lt.s32.totalorder %s27_s12, %s27_s12 }
  0x1b   :  { %p180_p11 = scmp.ne.s32.totalorder %s27_s12, %s179_s3  ;;  %p185_p13 = scmp.lt.s32.totalorder %s179_s3, %s179_s3 }
  0x1d   :  { %p186_p0 = por %p185_p13, %p184_p12 }
  0x1f   :  { %p187_p1 = pnand %p186_p0, %p180_p11 }
  0x21   :  { %190 = shalt.err (!%p187_p1)
}
  0x22   :  { %29 = dma.hbm_to_vmem [thread:$0]  %s276_s1, 128, %s27_s12, [#allocation6]  }
  0x23   :  { %213 = dma.done.wait [#allocation3], 16  }
  0x24   :  { %214 = vsyncadd [#allocation3], 4294967280 }
  0x25   :  { %215 = dma.done.wait [#allocation6], 128  }
  0x26   :  { %216 = vsyncadd [#allocation6], 4294967168  ;;  %v221_v0 = vmov 0.0   ;;  %vm222_vm0 = vmmov 0   ;;  %vm38_vm1 = vcmask 261120   ;;  %v37_v1 = vld [vmem:[#allocation5] sm:$0xff] }
  0x27   :  { %137 = vmatprep.subr.mxu0 %v221_v0  ;;  %139 = vmatprep.mubr.msk.f32.mxu0 %vm222_vm0, %v221_v0  ;;  %v36_v2 = vld [vmem:[#allocation2] sm:$0x1]  ;;  %s223_s5 = smov [#allocation7]   ;;  %vm115_vm2 = vcmask 57344  }
  0x28   :  { %138 = vmatpush3.xpose.msk.msra.mxu0 %vm38_vm1, %v37_v1  ;;  %s123_s6 = sshll.u32 %s223_s5, 4  ;;  %s124_s6 = int_to_ptr.vmem [resolvable:$true] %s123_s6 }
  0x29   :  { %s191_s1 = scalar_lea.vmem %s124_s6, 16  ;;  %s195_s7 = scalar_lea.vmem %s124_s6, 32 }
  0x2a   :  { %p192_p2 = scmp.ne.s32.totalorder %s124_s6, %s191_s1  ;;  %p196_p3 = scmp.lt.s32.totalorder %s124_s6, %s124_s6 }
  0x2b   :  { %140 = vmatmul.mubr.msk.f32.vlgmr.msra.gmra.mrb[0].mxu0 %vm38_vm1, %v36_v2  ;;  %p197_p4 = scmp.lt.s32.totalorder %s195_s7, %s191_s1 }
  0x2d   :  { %p198_p5 = por %p197_p4, %p196_p3 }
  0x2f   :  { %p199_p6 = pnand %p198_p5, %p192_p2 }
  0xfe   :  { %v111_v3 = vpop.f32.mrb[0].mxu0 }
  0xff   :  { %v141_v4 = vpop.f32.mrb[1].mxu0  ;;  %116 = vst.msk [vmem:[#allocation7] sm:$0x1] %vm115_vm2, %v111_v3 }
 0x100   :  { %202 = shalt.err (!%p199_p6)
}
 0x101   :  { %s203_s10 = scalar_lea.hbm %s277_s2, 16 }
 0x102   :  { %p204_p7 = scmp.ne.s32.totalorder %s277_s2, %s203_s10  ;;  %p207_p8 = scmp.lt.u32.totalorder %s203_s10, %s277_s2 }
 0x104   :  { %p209_p9 = pnand %p207_p8, %p204_p7 }
 0x106   :  { %212 = shalt.err (!%p209_p9)
}
 0x107   :  { %126 = dma.vmem_to_hbm [thread:$0]  %s124_s6, 16, %s277_s2, [#allocation4]  }
 0x108   :  { %217 = dma.done.wait [#allocation4], 16  }
 0x109   :  { %218 = vsyncadd [#allocation4], 4294967280 }
 0x10a   :  { %130 = vsyncpa [#allocation3], 1 }
 0x10b   :  { %131 = vsyncpa [#allocation6], 1 }
 0x10c   :  { %132 = vsyncpa [#allocation4], 1 }

</bundles_post_ra>
